<compile_context>
chip_gen: v6e
topology: v6e:2x2x1
jax: 0.10.0
libtpu: 0.0.40
codegen_flags: <defaults>
</compile_context>

<pallas_src>
import math

import jax
import jax.numpy as jnp
from jax.experimental import pallas as pl
from jax.experimental.pallas import tpu as pltpu


_LANE = 128
_SUBLANE_BY_ITEMSIZE = {4: 8, 2: 16, 1: 32}   # f32 / bf16 / int8-fp8
_MAX_TILE_ROWS = 1024          # past the measured per-step-overhead knee
_MIN_TILE_ROWS = 256           # don't chunk the feature axis unless rows fall below this
_MIN_FEATURE_CHUNK = 512       # never shrink a feature chunk below 512 lanes


def _round_up(x, m):
    return ((x + m - 1) // m) * m


def _vmem_budget_and_limit():
    """Generation-aware VMEM working-set budget and scoped-VMEM limit."""
    try:
        cap = int(pltpu.get_tpu_info().vmem_capacity_bytes)
    except Exception:
        cap = 64 * 1024 * 1024   # conservative default: v7x has 64 MiB per TensorCore
    budget = min(cap // 3, 48 * 1024 * 1024)
    limit = min((3 * cap) // 4, 96 * 1024 * 1024)
    return budget, limit


def _pick_feature_chunk(half, itemsize, budget):
    """Prefer feature_chunk = half; only split (lane-aligned, >=512 lanes) when
    the row tile would otherwise drop below the per-step-overhead knee."""
    def rows_for(fc):
        # 3 live blocks per step (x, gate, out), each double-buffered.
        return budget // (6 * fc * itemsize)

    if rows_for(half) >= _MIN_TILE_ROWS:
        return half

    n_lane_blocks = half // _LANE
    for n_chunks in range(2, n_lane_blocks + 1):
        if n_lane_blocks % n_chunks:
            continue
        fc = half // n_chunks
        if fc < _MIN_FEATURE_CHUNK:
            break
        if rows_for(fc) >= _MIN_TILE_ROWS:
            return fc
    return half   # no acceptable divisor; keep contiguous rows, smaller row tile


def _pick_tile_rows(rows, bytes_per_row, sublane, budget):
    tr = max(sublane, budget // max(bytes_per_row, 1))
    tr = min(tr, _MAX_TILE_ROWS, _round_up(rows, sublane))
    tr = max(sublane, (tr // sublane) * sublane)
    # v7x megacore: make sure the (parallel) row axis has >= 2 blocks so both
    # TensorCores get work. Harmless extra grid step on single-TC v5e/v6e.
    if rows > sublane and pl.cdiv(rows, tr) < 2:
        tr = max(sublane, _round_up(pl.cdiv(rows, 2), sublane))
    return tr


def _glu_split_kernel(x_ref, gate_ref, out_ref):
    # x_ref, gate_ref, out_ref: (tile_rows, feature_chunk), lane-aligned halves.
    out_ref[...] = x_ref[...] * jax.nn.sigmoid(gate_ref[...])


def _glu_fused_kernel(in_ref, out_ref):
    # Fallback for tiny / non-128-aligned feature halves: split in-kernel.
    h = out_ref.shape[-1]
    out_ref[...] = in_ref[:, :h] * jax.nn.sigmoid(in_ref[:, h:])


def gated_linear_unit(inputs, tile_rows=None, feature_chunk=None):
    """GLU over the last axis: x, gate = split(inputs, 2, -1); x * sigmoid(gate)."""
    orig_shape = inputs.shape
    d = orig_shape[-1]
    if d % 2 != 0:
        raise ValueError("last dim must be even for GLU chunk(2, dim=-1)")
    half = d // 2
    rows = math.prod(orig_shape[:-1])
    dtype = inputs.dtype
    itemsize = jnp.dtype(dtype).itemsize
    sublane = _SUBLANE_BY_ITEMSIZE.get(itemsize, 8)
    budget, vmem_limit = _vmem_budget_and_limit()

    x2d = inputs.reshape(rows, d)
    aligned = (half % _LANE == 0)

    if aligned:
        # ---------- fast path: two lane-aligned half blocks ----------
        if feature_chunk is None:
            feature_chunk = _pick_feature_chunk(half, itemsize, budget)
        assert half % feature_chunk == 0 and feature_chunk % _LANE == 0
        fc_blocks = half // feature_chunk

        if tile_rows is None:
            tile_rows = _pick_tile_rows(rows, 6 * feature_chunk * itemsize,
                                        sublane, budget)

        grid = (pl.cdiv(rows, tile_rows), fc_blocks)
        x_spec = pl.BlockSpec((tile_rows, feature_chunk), lambda i, j: (i, j))
        gate_spec = pl.BlockSpec(
            (tile_rows, feature_chunk), lambda i, j: (i, j + fc_blocks))
        out_spec = pl.BlockSpec((tile_rows, feature_chunk), lambda i, j: (i, j))

        out2d = pl.pallas_call(
            _glu_split_kernel,
            out_shape=jax.ShapeDtypeStruct((rows, half), dtype),
            grid_spec=pltpu.PrefetchScalarGridSpec(
                num_scalar_prefetch=0,
                grid=grid,
                in_specs=[x_spec, gate_spec],
                out_specs=out_spec,
            ),
            compiler_params=pltpu.CompilerParams(
                dimension_semantics=("parallel", "parallel"),
                vmem_limit_bytes=vmem_limit,
            ),
        )(x2d, x2d)
    else:
        # ---------- fallback: full-width block, split in-kernel ----------
        if tile_rows is None:
            tile_rows = _pick_tile_rows(rows, 3 * d * itemsize, sublane, budget)

        grid = (pl.cdiv(rows, tile_rows),)
        out2d = pl.pallas_call(
            _glu_fused_kernel,
            out_shape=jax.ShapeDtypeStruct((rows, half), dtype),
            grid_spec=pltpu.PrefetchScalarGridSpec(
                num_scalar_prefetch=0,
                grid=grid,
                in_specs=[pl.BlockSpec((tile_rows, d), lambda i: (i, 0))],
                out_specs=pl.BlockSpec((tile_rows, half), lambda i: (i, 0)),
            ),
            compiler_params=pltpu.CompilerParams(
                dimension_semantics=("parallel",),
                vmem_limit_bytes=vmem_limit,
            ),
        )(x2d)

    return out2d.reshape(*orig_shape[:-1], half)


def _reference_glu(inputs):
    half = inputs.shape[-1] // 2
    x = inputs[..., :half]
    gate = inputs[..., half:]
    return x * jax.nn.sigmoid(gate)


if __name__ == "__main__":
    key = jax.random.PRNGKey(0)

    # Small shape consistent with the module: batch=2, seq=8, hidden=32
    # (output hidden = 16). Exercises the non-aligned fallback path.
    B, S, D = 2, 8, 32
    x_small = jax.random.normal(key, (B, S, D), dtype=jnp.float32)
    out_small = jax.block_until_ready(gated_linear_unit(x_small))
    ref_small = _reference_glu(x_small)
    assert out_small.shape == (B, S, D // 2), out_small.shape
    assert jnp.allclose(out_small, ref_small, atol=1e-5, rtol=1e-5), \
        "mismatch vs reference (fallback path)"

    # Lane-aligned fast path (half = 256 is a multiple of 128).
    D2 = 512
    x_big = jax.random.normal(jax.random.PRNGKey(0), (B, S, D2), dtype=jnp.float32)
    out_big = jax.block_until_ready(gated_linear_unit(x_big))
    ref_big = _reference_glu(x_big)
    assert out_big.shape == (B, S, D2 // 2), out_big.shape
    assert jnp.allclose(out_big, ref_big, atol=1e-5, rtol=1e-5), \
        "mismatch vs reference (aligned path)"

    # Ragged rows (rows=14 not a multiple of tile_rows): validates the
    # pad-free grid masking path.
    x_ragged = jax.random.normal(jax.random.PRNGKey(0), (2, 7, D2), dtype=jnp.float32)
    out_ragged = jax.block_until_ready(gated_linear_unit(x_ragged))
    ref_ragged = _reference_glu(x_ragged)
    assert out_ragged.shape == (2, 7, D2 // 2), out_ragged.shape
    assert jnp.allclose(out_ragged, ref_ragged, atol=1e-5, rtol=1e-5), \
        "mismatch vs reference (ragged rows path)"

    print("KERNEL_OK")
</pallas_src>

<mosaic_0001>
module attributes {stable_mosaic.version = 11 : i64} {
  func.func @_glu_fused_kernel(%arg0: i32, %arg1: memref<8x32xf32, #tpu.memory_space<vmem>>, %arg2: memref<8x16xf32, #tpu.memory_space<vmem>>) attributes {dimension_semantics = [#tpu.dimension_semantics<parallel>], iteration_bounds = array<i64: 2>, scalar_prefetch = 0 : i64, scratch_operands = 0 : i64, tpu.core_type = #tpu.core_type<tc>, window_params = [{transform_indices = @transform_0, window_bounds = array<i64: 8, 32>}, {transform_indices = @transform_1, window_bounds = array<i64: 8, 16>}]} {
    %c0 = arith.constant 0 : index
    %c0_0 = arith.constant 0 : index
    %0 = vector.load %arg1[%c0, %c0_0] : memref<8x32xf32, #tpu.memory_space<vmem>>, vector<8x16xf32>
    %c0_1 = arith.constant 0 : index
    %c16 = arith.constant 16 : index
    %1 = vector.load %arg1[%c0_1, %c16] : memref<8x32xf32, #tpu.memory_space<vmem>>, vector<8x16xf32>
    %2 = arith.negf %1 : vector<8x16xf32>
    %3 = math.exp %2 : vector<8x16xf32>
    %cst = arith.constant 1.000000e+00 : f32
    %4 = vector.broadcast %cst : f32 to vector<8x16xf32>
    %5 = arith.addf %4, %3 : vector<8x16xf32>
    %6 = arith.divf %4, %5 : vector<8x16xf32>
    %7 = arith.mulf %0, %6 : vector<8x16xf32>
    %c0_2 = arith.constant 0 : index
    %c0_3 = arith.constant 0 : index
    %8 = vector.load %arg2[%c0_2, %c0_3] : memref<8x16xf32, #tpu.memory_space<vmem>>, vector<8x16xf32>
    tpu.vector_store %arg2[%c0_2, %c0_3], %7 {strides = array<i32>} : memref<8x16xf32, #tpu.memory_space<vmem>>, vector<8x16xf32>,
    return
  }
  func.func @transform_0(%arg0: i32) -> (i32, i32) {
    %c0_i32 = arith.constant 0 : i32
    %c0_i32_0 = arith.constant 0 : i32
    return %arg0, %c0_i32 : i32, i32
  }
  func.func @transform_1(%arg0: i32) -> (i32, i32) {
    %c0_i32 = arith.constant 0 : i32
    %c0_i32_0 = arith.constant 0 : i32
    return %arg0, %c0_i32 : i32, i32
  }
}

</mosaic_0001>

<bundles_post_ra>
// kernel: tpu_custom_call.1
= control target key start
LH: loop header
LB: loop body
LE: loop exit
PB: predicated region body
PF: predicated region fallthrough
CT: control target
= control target key end

     0   :  { %6 = vsyncpa [#allocation3], 0  ;;  %s542_s0 = inlined_call_operand.hbm [shape: f32[16,32], index: 0, kind: input, shape index: {}]   ;;  %s543_s1 = inlined_call_operand.hbm [shape: f32[16,16], index: 1, kind: output, shape index: {}]  }
   0x1   :  { %8 = vsyncpa [#allocation3 + $0x1], 0 }
   0x2   :  { %9 = vsyncpa [#allocation4], 0 }
   0x3   :  { %11 = vsyncpa [#allocation4 + $0x1], 0  ;;  %s401_s6 = smov 0   ;;  %s403_s7 = smov 0  }
   0x4   :  { %s405_s8 = smov 0   ;;  %s407_s9 = smov 0  }
   0x5 LB: > { %s422_s10 = sadd.s32 4294967295, %s386_s9   ;;  %s230_s11 = sadd.s32 4294967294, %s386_s9   ;;  %s386_s9 = sphi %s407_s9, %s560_s9   ;;  %s382_s8 = sphi %s405_s8, %s559_s8   ;;  %s378_s7 = sphi %s403_s7, %s558_s7   ;;  %s374_s6 = sphi %s401_s6, %s557_s6  }
   0x6   : > { %s426_s12 = sadd.s32 1, %s386_s9   ;;  %s24_s13 = sadd.s32 1, %s382_s8 }
   0x7   : > { %s21_s14 = ssub.s32 %s386_s9, %s426_s12  ;;  %p31_p0 = scmp.ne.s32.totalorder %s382_s8, %s378_s7 }
   0x8   : > { %p22_p1 = scmp.eq.s32.totalorder %s21_s14, 0  ;;  %p32_p2 = scmp.eq.s32.totalorder %s386_s9, 0 }
   0x9   : > { %p37_p3 = scmp.ne.s32.totalorder %s378_s7, %s374_s6  ;;  %p38_p4 = scmp.eq.s32.totalorder %s422_s10, 0 }
   0xa   : > { %s438_s15 = scalar_select %p22_p1, %s382_s8, %s24_s13  }
   0xb   : > { %p440_p5 = por %p32_p2, %p31_p0  ;;  %p444_p6 = por %p38_p4, %p37_p3 }
   0xc   : > { %p61_p7 = scmp.eq.s32.totalorder %s422_s10, 1  ;;  %p67_p8 = scmp.eq.s32.totalorder %s230_s11, 1 }
   0xd   : > { %s547_s17 = scalar_select %p444_p6, 1, 0 }
   0xe   : > { %p255_p10 = scmp.lt.s32.totalorder %s386_s9, 2  ;;  %p451_p11 = por %p61_p7, %p31_p0 }
   0xf   : > { %p455_p12 = por %p67_p8, %p37_p3  ;;  %s87_s20 = sand.u32 1, %s382_s8  }
  0x10   : > { %s548_s18 = scalar_select %p451_p11, 1, 0 }
  0x11   : > { %s549_s19 = scalar_select %p455_p12, 1, 0 }
  0x12   : > { %s234_s21 = sshll.u32 %s386_s9, 7  ;;  %s233_s22 = sshll.u32 %s87_s20, 3 }
  0x13   : > { %s464_s25 = scalar_lea.hbm %s542_s0, %s234_s21  ;;  %s91_s26 = scalar_lea.vmem [#allocation2], %s233_s22 }
  0x14   : > { %s98_s27 = sshll.u32 %s91_s26, 4  ;;  %p468_p13 = pnand %p255_p10, %p440_p5  ;;  %s472_s27 = int_to_ptr.vmem [resolvable:$true] %s98_s27 }
  0x15   : > { %s88_s29 = scalar_lea.sflag [#allocation3], %s87_s20  ;;  %s294_s30 = scalar_lea.hbm %s464_s25, 128 }
  0x16   : > { %p295_p2 = scmp.ne.s32.totalorder %s464_s25, %s294_s30  ;;  %p296_p3 = pneg %p468_p13 }
  0x17   : > { %s299_s4 = scalar_lea.hbm %s542_s0, 256  ;;  %p300_p5 = scmp.lt.s32.totalorder %s464_s25, %s542_s0 }
  0x18   : > { %p297_p4 = pnand %p296_p3, %p295_p2  ;;  %p301_p8 = scmp.lt.s32.totalorder %s299_s4, %s294_s30 }
  0x1a   : > { %p298_p7 = pneg %p297_p4  ;;  %p302_p10 = por %p301_p8, %p300_p5 }
  0x1c   : > { %p303_p9 = pnand %p302_p10, %p298_p7 }
  0x1e   : > { %306 = shalt.err (!%p303_p9)
}
  0x1f   : > { %s307_s13 = scalar_lea.vmem %s472_s27, 128  ;;  %s388_s14 = smov [#allocation2]  }
  0x20   : > { %p308_p0 = scmp.ne.s32.totalorder %s472_s27, %s307_s13  ;;  %s312_s16 = sshll.u32 %s388_s14, 4  ;;  %s313_s16 = int_to_ptr.vmem [resolvable:$false] %s312_s16 }
  0x21   : > { %s314_s20 = scalar_lea.vmem %s313_s16, 256  ;;  %p315_p4 = scmp.lt.s32.totalorder %s472_s27, %s313_s16 }
  0x22   : > { %p310_p1 = pnand %p308_p0, %p296_p3  ;;  %p316_p12 = scmp.lt.s32.totalorder %s314_s20, %s307_s13 }
  0x24   : > { %p311_p2 = pneg %p310_p1  ;;  %p317_p11 = por %p316_p12, %p315_p4 }
  0x26   : > { %p318_p6 = pnand %p317_p11, %p311_p2 }
  0x28   : > { %321 = shalt.err (!%p318_p6)
}
  0x29   : > { %250 = dma.hbm_to_vmem [thread:$0]  (!%p468_p13), %s464_s25, 128, %s472_s27, %s88_s29  }
  0x2a   : > { %p551_p9 = scmp.lt.s32.totalorder %s386_s9, 3  ;;  %p552_p7 = scmp.ge.s32.totalorder %s386_s9, 1 }
  0x2c   : > { %p104_p0 = pnand %p552_p7, %p551_p9 }
  0x2d   : > { %s499_s21 = sand.u32 (!%p104_p0), 1, %s378_s7   ;;  %p553_p6 = scmp.ne.s32.totalorder (!%p104_p0), %s547_s17, 0 }
  0x2e   : > { %107 = sbr.rel (%p104_p0) target bundleno = 215 (0xd7), region = 24  ;;  %s236_s22 = sshll.u32 (!%p104_p0), %s499_s21, 3 }
  0x2f   : > { %s110_s23 = scalar_lea.sflag (!%p104_p0), [#allocation3], %s499_s21  ;;  %s113_s24 = scalar_lea.vmem (!%p104_p0), [#allocation2], %s236_s22 }
  0x33   : > { %365 = dma.done.wait (%p553_p6), %s110_s23, 128  }
  0x34   : > { %367 = vsyncadd (%p553_p6), %s110_s23, 4294967168  ;;  %v132_v0 = vld [vmem:[%s113_s24] sm:$0xff]  ;;  %s389_s25 = smov 112   ;;  %s240_s26 = sshll.u32 %s422_s10, 7  ;;  %vm144_vm0 = vcmask 130048  }
  0x35   : > { %v238_v1 = vmul.f32 -1.442695, %v132_v0  ;;  %s131_s27 = scalar_lea.vmem [#allocation5], %s236_s22  ;;  %s158_s30 = scalar_lea.hbm %s543_s1, %s240_s26 }
  0x36   : > { %s160_s28 = sshll.u32 %s131_s27, 4  ;;  %s147_s2 = scalar_lea.sflag [#allocation4], %s499_s21  ;;  %s161_s28 = int_to_ptr.vmem [resolvable:$true] %s160_s28 }
  0x37   : > { %290 = vpow2.f32 %v238_v1  ;;  %s322_s3 = scalar_lea.vmem %s161_s28, 128  ;;  %p554_p12 = scmp.ne.s32.totalorder %s548_s18, 0 }
  0x38   : > { %p323_p11 = scmp.ne.s32.totalorder %s161_s28, %s322_s3  ;;  %s390_s4 = smov [#allocation5]  }
  0x39   : > { %s326_s5 = sshll.u32 %s390_s4, 4  ;;  %s327_s5 = int_to_ptr.vmem [resolvable:$false] %s326_s5 }
  0x3a   : > { %p324_p13 = pnand %p323_p11, %p554_p12  ;;  %s328_s10 = scalar_lea.vmem %s327_s5, 256 }
  0x3b   : > { %p329_p3 = scmp.lt.s32.totalorder %s161_s28, %s327_s5  ;;  %p330_p5 = scmp.lt.s32.totalorder %s328_s10, %s322_s3 }
  0x3c   : > { %p325_p1 = pneg %p324_p13 }
  0x3d   : > { %p331_p8 = por %p330_p5, %p329_p3 }
  0x3f   : > { %p332_p10 = pnand %p331_p8, %p325_p1 }
  0x44   : > { %v291_v2 = vpop.eup %290 }
  0x45   : > { %v136_v3 = vadd.f32 1.0, %v291_v2 }
  0x47   : > { %292 = vrcp.f32 %v136_v3 }
  0x54   : > { %v293_v4 = vpop.eup %292 }
  0x55   : > { %140 = vrot.lane.b32.xlu0 %v293_v4, %s389_s25 }
  0xc7   : > { %v141_v5 = vpop.permute.xlu0 %140 }
  0xc8   : > { %v143_v6 = vmul.f32 %v141_v5, %v132_v0 }
  0xca   : > { %145 = vst.msk [vmem:[%s131_s27] sm:$0xff] %vm144_vm0, %v143_v6 }
  0xcb   : > { %335 = shalt.err (!%p332_p10)
}
  0xcc   : > { %s336_s11 = scalar_lea.hbm %s158_s30, 128  ;;  %s340_s16 = scalar_lea.hbm %s543_s1, 256 }
  0xcd   : > { %p337_p2 = scmp.ne.s32.totalorder %s158_s30, %s336_s11  ;;  %p341_p7 = scmp.lt.s32.totalorder %s158_s30, %s543_s1 }
  0xce   : > { %p342_p0 = scmp.lt.s32.totalorder %s340_s16, %s336_s11 }
  0xcf   : > { %p338_p4 = pnand %p337_p2, %p554_p12 }
  0xd0   : > { %p343_p6 = por %p342_p0, %p341_p7 }
  0xd1   : > { %p339_p9 = pneg %p338_p4 }
  0xd3   : > { %p344_p11 = pnand %p343_p6, %p339_p9 }
  0xd5   : > { %347 = shalt.err (!%p344_p11)
}
  0xd6   : > { %245 = dma.vmem_to_hbm [thread:$0]  (%p554_p12), %s161_s28, 128, %s158_s30, %s147_s2  }
  0xd7 PF: > { %s172_s22 = sand.u32 1, %s374_s6   ;;  %p555_p13 = scmp.ne.s32.totalorder %s549_s19, 0 }
  0xd8   : > { %p556_p1 = scmp.ge.s32.totalorder %s386_s9, 2  ;;  %s173_s23 = scalar_lea.sflag [#allocation4], %s172_s22 }
  0xda   : > { %p252_p3 = pnand %p556_p1, %p555_p13 }
  0xdc   : > { %p253_p5 = pneg %p252_p3 }
  0xde   : > { %369 = dma.done.wait (%p253_p5), %s173_s23, 128  }
  0xdf   : > { %371 = vsyncadd (%p253_p5), %s173_s23, 4294967168  ;;  %p14_p8 = scmp.ge.s32.totalorder %s426_s12, 4   ;;  %s557_s6 = smov %s378_s7 }
  0xe0   : > { %s558_s7 = smov %s382_s8  ;;  %s559_s8 = smov %s438_s15 }
  0xe1   : > { %s560_s9 = smov %s426_s12  ;;  %16 = sbr.rel (!%p14_p8) target bundleno = 5 (0x5), region = 69 }
  0xe6   :  { %178 = vsyncpa [#allocation3], 1 }
  0xe7   :  { %180 = vsyncpa [#allocation3 + $0x1], 1 }
  0xe8   :  { %181 = vsyncpa [#allocation4], 1 }
  0xe9   :  { %183 = vsyncpa [#allocation4 + $0x1], 1 }

</bundles_post_ra>
